<compile_context>
chip_gen: v6e
topology: v6e:2x2x1
jax: 0.10.0
libtpu: 0.0.40
codegen_flags: <defaults>
</compile_context>

<pallas_src>
import jax
import jax.numpy as jnp
from jax import lax
from jax.experimental import pallas as pl
from jax.experimental.pallas import tpu as pltpu

LANE = 128


def _make_pointwise_kernel(cin, cout, ts, chunk):
    """out[0, co, s] = sum_ci w[co, ci] * x[0, ci, s] + b[co]  (pure VPU)."""
    n_chunks = ts // chunk

    def kernel(w_ref, b_ref, x_ref, o_ref):
        # w_ref: (Cin, Cout, 1) VMEM  (weight pre-transposed: w_ref[ci] is the
        #         ready-made (Cout, 1) sublane vector for input channel ci)
        # b_ref: (1, Cout, 1)  VMEM
        # x_ref: (1, Cin, TS)  VMEM    o_ref: (1, Cout, TS) VMEM
        # Hoist per-input-channel weight vectors + bias out of the chunk loop
        # (JAX does not CSE broadcast_in_dim).
        w_cols = [w_ref[ci][None, :, :] for ci in range(cin)]   # (1, Cout, 1)
        bias_b = b_ref[...]                                     # (1, Cout, 1)

        def one_chunk(off):
            xb = x_ref[:, :, pl.ds(off, chunk)]                 # (1, Cin, chunk)
            acc = xb[:, 0:1, :] * w_cols[0]                     # (1, Cout, chunk)
            for ci in range(1, cin):
                acc = acc + xb[:, ci:ci + 1, :] * w_cols[ci]
            acc = acc + bias_b
            o_ref[:, :, pl.ds(off, chunk)] = acc.astype(o_ref.dtype)

        if n_chunks <= 4:
            # Small static trip count: fully unrolled, constant aligned offsets.
            for c in range(n_chunks):
                one_chunk(c * chunk)
        else:
            def body(c, carry):
                one_chunk(pl.multiple_of(c * chunk, chunk))
                return carry
            lax.fori_loop(0, n_chunks, body, 0)

    return kernel


def _choose_spatial_tile(s, batch, cin, cout, *, max_ts=8192, min_steps=4,
                         vmem_budget_bytes=8 << 20):
    """Pick a lane-dense spatial tile TS and padded spatial size."""
    pad8 = lambda c: -(-c // 8) * 8
    # Double-buffered in + out blocks per grid step (f32, channels pad to 8
    # sublanes).  Budget is safe on every generation (v7x scoped VMEM = 32 MiB).
    bytes_per_lane = 2 * (pad8(cin) + pad8(cout)) * 4
    ts_cap = max(LANE, (vmem_budget_bytes // bytes_per_lane) // LANE * LANE)
    max_ts = max(LANE, min(max_ts, ts_cap))

    s_pad = -(-s // LANE) * LANE
    if s_pad <= max_ts:
        ts = s_pad
    else:
        ts = LANE
        for cand in range(max_ts, LANE - 1, -LANE):
            if s_pad % cand == 0:
                ts = cand
                break
        if ts < 512:
            # Awkward factorization: pad up to a decent tile instead of running
            # hundreds of 128-lane grid steps.
            ts = min(2048, max_ts)
            s_pad = -(-s_pad // ts) * ts

    # Megacore occupancy (v7x has 2 TensorCores): keep >= min_steps grid steps.
    while ts % 256 == 0 and batch * (s_pad // ts) < min_steps:
        ts //= 2
    return ts, s_pad


def _choose_chunk(ts, target=1024):
    """Lane-chunk for the in-kernel loop (bounds live vregs to ~16-24)."""
    if ts <= target:
        return ts
    for cand in (1024, 512, 256, 128):
        if ts % cand == 0:
            return cand
    return LANE


def pointwise_conv3d_1x1(x_ncdhw, weight, bias, *, max_ts=8192):
    """1x1x1 Conv3d on NCDHW input.  weight: (Cout, Cin), bias: (Cout,)."""
    B, Cin, D, H, W = x_ncdhw.shape
    Cout = weight.shape[0]
    S = D * H * W
    x_flat = x_ncdhw.reshape(B, Cin, S)          # free reshape, no transpose

    ts, s_pad = _choose_spatial_tile(S, B, Cin, Cout, max_ts=max_ts)
    if s_pad != S:
        # TODO(synk): mask the ragged tail in-kernel (scalar-prefetch S +
        # pltpu.store mask) to drop this extra HBM pass; only hit when S is
        # not already a multiple of 128.
        x_flat = jnp.pad(x_flat, ((0, 0), (0, 0), (0, s_pad - S)))

    chunk = _choose_chunk(ts)
    w_t = jnp.transpose(weight).reshape(Cin, Cout, 1)   # 64 B, free
    b_3d = bias.reshape(1, Cout, 1)

    # bf16 I/O would halve HBM traffic on v6e/v7x (keep f32 accumulation);
    # kept f32 here to match the PyTorch reference exactly.
    out_flat = pl.pallas_call(
        _make_pointwise_kernel(Cin, Cout, ts, chunk),
        out_shape=jax.ShapeDtypeStruct((B, Cout, s_pad), x_ncdhw.dtype),
        grid_spec=pltpu.PrefetchScalarGridSpec(
            num_scalar_prefetch=0,
            grid=(B, s_pad // ts),
            in_specs=[
                # tiny channel-mix constants: full-extent VMEM blocks with a
                # constant index_map -> fetched once, resident across the grid
                pl.BlockSpec((Cin, Cout, 1), lambda b, s: (0, 0, 0)),
                pl.BlockSpec((1, Cout, 1), lambda b, s: (0, 0, 0)),
                pl.BlockSpec((1, Cin, ts), lambda b, s: (b, 0, s)),
            ],
            out_specs=pl.BlockSpec((1, Cout, ts), lambda b, s: (b, 0, s)),
        ),
        compiler_params=pltpu.CompilerParams(
            dimension_semantics=("parallel", "parallel")),
    )(w_t, b_3d, x_flat)

    if s_pad != S:
        out_flat = out_flat[:, :, :S]
    return out_flat.reshape(B, Cout, D, H, W)


def _spectral_truncate(ft, dim1, dim2, dim3):
    """Zero spectrum except the 4 low-frequency corner blocks of ft.

    Single masked select (one elementwise pass) instead of zeros_like + four
    scatter updates; identical semantics to the PyTorch slice assignments,
    including the degenerate ':0' / '-0:' cases.
    """
    Dn, Hn, Wr = ft.shape[-3], ft.shape[-2], ft.shape[-1]
    d1h, d2h, d3h = dim1 // 2, dim2 // 2, dim3 // 2

    def both_ends(n, half):
        if half == 0:              # ':0' empty, '-0:' whole axis -> union = all
            return jnp.ones((n,), bool)
        i = jnp.arange(n)
        return (i < half) | (i >= n - half)

    def low_only(n, half):
        if half == 0:              # ':0' selects nothing
            return jnp.zeros((n,), bool)
        return jnp.arange(n) < half

    mask = (both_ends(Dn, d1h)[:, None, None]
            & both_ends(Hn, d2h)[None, :, None]
            & low_only(Wr, d3h)[None, None, :])
    return jnp.where(mask, ft, jnp.zeros((), ft.dtype))


def pointwise_op_3d(x, weight, bias, dim1, dim2, dim3):
    """Mirror of pointwise_op_3D.forward (x is NCDHW float32)."""
    # 1) pointwise 1x1x1 conv (Pallas kernel).
    x_out = pointwise_conv3d_1x1(x, weight, bias)

    # 2) spectral truncation.
    # TODO(synk): rfftn/irfftn (complex FFT) have no Pallas equivalent; kept in XLA.
    ft = jnp.fft.rfftn(x_out, axes=(-3, -2, -1))
    ft_u = _spectral_truncate(ft, dim1, dim2, dim3)
    # torch/jnp irfftn with s=... trims each transformed axis to its FIRST s[i]
    # entries (last axis to s[-1]//2+1) before the inverse transform -> exact
    # semantic match with the PyTorch module, including when D > dim1.
    x_out = jnp.fft.irfftn(ft_u, s=(dim1, dim2, dim3), axes=(-3, -2, -1))

    # 3) F.interpolate(..., size=(dim1,dim2,dim3), mode='trilinear',
    #    align_corners=True) on an input already of that size is the identity.
    return x_out


if __name__ == "__main__":
    key = jax.random.PRNGKey(0)
    B, Cin, Cout = 2, 4, 4
    D = H = W = 16
    dim1 = dim2 = dim3 = 8

    kx, kw, kb = jax.random.split(key, 3)
    x = jax.random.normal(kx, (B, Cin, D, H, W), dtype=jnp.float32)

    # Conv3d(in_channel, out_channel, 1) params: weight (Cout, Cin, 1, 1, 1)
    # squeezed to (Cout, Cin), bias (Cout,).
    bound = 1.0 / (Cin ** 0.5)
    weight = jax.random.uniform(kw, (Cout, Cin), minval=-bound, maxval=bound,
                                dtype=jnp.float32)
    bias = jax.random.uniform(kb, (Cout,), minval=-bound, maxval=bound,
                              dtype=jnp.float32)

    # One jit over the whole forward keeps the FFT-stage masking fused/in-place.
    fwd = jax.jit(pointwise_op_3d, static_argnums=(3, 4, 5))
    out = jax.block_until_ready(fwd(x, weight, bias, dim1, dim2, dim3))
    assert out.shape == (B, Cout, dim1, dim2, dim3)

    # Conv-stage check: Pallas kernel vs pure-jnp 1x1x1 conv.
    pallas_conv = jax.block_until_ready(pointwise_conv3d_1x1(x, weight, bias))
    ref_conv = (jnp.einsum('bcdhw,oc->bodhw', x, weight)
                + bias[None, :, None, None, None])
    assert jnp.allclose(ref_conv, pallas_conv, atol=1e-5, rtol=1e-5)

    # End-to-end check against a pure-jnp mirror of the module (explicit
    # zeros + slice-set construction, validating the masked-select refactor).
    ft_r = jnp.fft.rfftn(ref_conv, axes=(-3, -2, -1))
    d1h, d2h, d3h = dim1 // 2, dim2 // 2, dim3 // 2
    ft_ur = jnp.zeros_like(ft_r)
    ft_ur = ft_ur.at[:, :, :d1h, :d2h, :d3h].set(ft_r[:, :, :d1h, :d2h, :d3h])
    ft_ur = ft_ur.at[:, :, -d1h:, :d2h, :d3h].set(ft_r[:, :, -d1h:, :d2h, :d3h])
    ft_ur = ft_ur.at[:, :, :d1h, -d2h:, :d3h].set(ft_r[:, :, :d1h, -d2h:, :d3h])
    ft_ur = ft_ur.at[:, :, -d1h:, -d2h:, :d3h].set(ft_r[:, :, -d1h:, -d2h:, :d3h])
    ref_out = jnp.fft.irfftn(ft_ur, s=(dim1, dim2, dim3), axes=(-3, -2, -1))
    assert jnp.allclose(out, ref_out, atol=1e-4, rtol=1e-4)

    print("KERNEL_OK")
</pallas_src>

<mosaic_0001>
module attributes {stable_mosaic.version = 11 : i64} {
  func.func @kernel(%arg0: i32, %arg1: i32, %arg2: memref<4x4x1xf32, #tpu.memory_space<vmem>>, %arg3: memref<1x4x1xf32, #tpu.memory_space<vmem>>, %arg4: memref<1x4x2048xf32, #tpu.memory_space<vmem>>, %arg5: memref<1x4x2048xf32, #tpu.memory_space<vmem>>) attributes {dimension_semantics = [#tpu.dimension_semantics<parallel>, #tpu.dimension_semantics<parallel>], iteration_bounds = array<i64: 2, 2>, scalar_prefetch = 0 : i64, scratch_operands = 0 : i64, tpu.core_type = #tpu.core_type<tc>, window_params = [{pipeline_mode = #tpu.pipeline_mode<synchronous>, transform_indices = @transform_0, window_bounds = array<i64: 4, 4, 1>}, {pipeline_mode = #tpu.pipeline_mode<synchronous>, transform_indices = @transform_1, window_bounds = array<i64: 1, 4, 1>}, {transform_indices = @transform_2, window_bounds = array<i64: 1, 4, 2048>}, {transform_indices = @transform_3, window_bounds = array<i64: 1, 4, 2048>}]} {
    %c0 = arith.constant 0 : index
    %c0_0 = arith.constant 0 : index
    %c0_1 = arith.constant 0 : index
    %0 = vector.load %arg2[%c0, %c0_0, %c0_1] : memref<4x4x1xf32, #tpu.memory_space<vmem>>, vector<1x4x1xf32>
    %1 = vector.shape_cast %0 : vector<1x4x1xf32> to vector<4x1xf32>
    %2 = vector.shape_cast %1 : vector<4x1xf32> to vector<1x4x1xf32>
    %c1 = arith.constant 1 : index
    %c0_2 = arith.constant 0 : index
    %c0_3 = arith.constant 0 : index
    %3 = vector.load %arg2[%c1, %c0_2, %c0_3] : memref<4x4x1xf32, #tpu.memory_space<vmem>>, vector<1x4x1xf32>
    %4 = vector.shape_cast %3 : vector<1x4x1xf32> to vector<4x1xf32>
    %5 = vector.shape_cast %4 : vector<4x1xf32> to vector<1x4x1xf32>
    %c2 = arith.constant 2 : index
    %c0_4 = arith.constant 0 : index
    %c0_5 = arith.constant 0 : index
    %6 = vector.load %arg2[%c2, %c0_4, %c0_5] : memref<4x4x1xf32, #tpu.memory_space<vmem>>, vector<1x4x1xf32>
    %7 = vector.shape_cast %6 : vector<1x4x1xf32> to vector<4x1xf32>
    %8 = vector.shape_cast %7 : vector<4x1xf32> to vector<1x4x1xf32>
    %c3 = arith.constant 3 : index
    %c0_6 = arith.constant 0 : index
    %c0_7 = arith.constant 0 : index
    %9 = vector.load %arg2[%c3, %c0_6, %c0_7] : memref<4x4x1xf32, #tpu.memory_space<vmem>>, vector<1x4x1xf32>
    %10 = vector.shape_cast %9 : vector<1x4x1xf32> to vector<4x1xf32>
    %11 = vector.shape_cast %10 : vector<4x1xf32> to vector<1x4x1xf32>
    %c0_8 = arith.constant 0 : index
    %c0_9 = arith.constant 0 : index
    %c0_10 = arith.constant 0 : index
    %12 = vector.load %arg3[%c0_8, %c0_9, %c0_10] : memref<1x4x1xf32, #tpu.memory_space<vmem>>, vector<1x4x1xf32>
    %c0_11 = arith.constant 0 : index
    %c0_12 = arith.constant 0 : index
    %c0_13 = arith.constant 0 : index
    %13 = vector.load %arg4[%c0_11, %c0_12, %c0_13] : memref<1x4x2048xf32, #tpu.memory_space<vmem>>, vector<1x4x1024xf32>
    %14 = vector.extract_strided_slice %13 {offsets = [0, 0, 0], sizes = [1, 1, 1024], strides = [1, 1, 1]} : vector<1x4x1024xf32> to vector<1x1x1024xf32>
    %15 = vector.broadcast %14 : vector<1x1x1024xf32> to vector<1x4x1024xf32>
    %16 = vector.broadcast %2 : vector<1x4x1xf32> to vector<1x4x1024xf32>
    %17 = arith.mulf %15, %16 : vector<1x4x1024xf32>
    %18 = vector.extract_strided_slice %13 {offsets = [0, 1, 0], sizes = [1, 1, 1024], strides = [1, 1, 1]} : vector<1x4x1024xf32> to vector<1x1x1024xf32>
    %19 = vector.broadcast %18 : vector<1x1x1024xf32> to vector<1x4x1024xf32>
    %20 = vector.broadcast %5 : vector<1x4x1xf32> to vector<1x4x1024xf32>
    %21 = arith.mulf %19, %20 : vector<1x4x1024xf32>
    %22 = arith.addf %17, %21 : vector<1x4x1024xf32>
    %23 = vector.extract_strided_slice %13 {offsets = [0, 2, 0], sizes = [1, 1, 1024], strides = [1, 1, 1]} : vector<1x4x1024xf32> to vector<1x1x1024xf32>
    %24 = vector.broadcast %23 : vector<1x1x1024xf32> to vector<1x4x1024xf32>
    %25 = vector.broadcast %8 : vector<1x4x1xf32> to vector<1x4x1024xf32>
    %26 = arith.mulf %24, %25 : vector<1x4x1024xf32>
    %27 = arith.addf %22, %26 : vector<1x4x1024xf32>
    %28 = vector.extract_strided_slice %13 {offsets = [0, 3, 0], sizes = [1, 1, 1024], strides = [1, 1, 1]} : vector<1x4x1024xf32> to vector<1x1x1024xf32>
    %29 = vector.broadcast %28 : vector<1x1x1024xf32> to vector<1x4x1024xf32>
    %30 = vector.broadcast %11 : vector<1x4x1xf32> to vector<1x4x1024xf32>
    %31 = arith.mulf %29, %30 : vector<1x4x1024xf32>
    %32 = arith.addf %27, %31 : vector<1x4x1024xf32>
    %33 = vector.broadcast %12 : vector<1x4x1xf32> to vector<1x4x1024xf32>
    %34 = arith.addf %32, %33 : vector<1x4x1024xf32>
    %c0_14 = arith.constant 0 : index
    %c0_15 = arith.constant 0 : index
    %c0_16 = arith.constant 0 : index
    %35 = vector.load %arg5[%c0_14, %c0_15, %c0_16] : memref<1x4x2048xf32, #tpu.memory_space<vmem>>, vector<1x4x1024xf32>
    tpu.vector_store %arg5[%c0_14, %c0_15, %c0_16], %34 {strides = array<i32>} : memref<1x4x2048xf32, #tpu.memory_space<vmem>>, vector<1x4x1024xf32>,
    %c0_17 = arith.constant 0 : index
    %c0_18 = arith.constant 0 : index
    %c1024 = arith.constant 1024 : index
    %36 = vector.load %arg4[%c0_17, %c0_18, %c1024] : memref<1x4x2048xf32, #tpu.memory_space<vmem>>, vector<1x4x1024xf32>
    %37 = vector.extract_strided_slice %36 {offsets = [0, 0, 0], sizes = [1, 1, 1024], strides = [1, 1, 1]} : vector<1x4x1024xf32> to vector<1x1x1024xf32>
    %38 = vector.broadcast %37 : vector<1x1x1024xf32> to vector<1x4x1024xf32>
    %39 = vector.broadcast %2 : vector<1x4x1xf32> to vector<1x4x1024xf32>
    %40 = arith.mulf %38, %39 : vector<1x4x1024xf32>
    %41 = vector.extract_strided_slice %36 {offsets = [0, 1, 0], sizes = [1, 1, 1024], strides = [1, 1, 1]} : vector<1x4x1024xf32> to vector<1x1x1024xf32>
    %42 = vector.broadcast %41 : vector<1x1x1024xf32> to vector<1x4x1024xf32>
    %43 = vector.broadcast %5 : vector<1x4x1xf32> to vector<1x4x1024xf32>
    %44 = arith.mulf %42, %43 : vector<1x4x1024xf32>
    %45 = arith.addf %40, %44 : vector<1x4x1024xf32>
    %46 = vector.extract_strided_slice %36 {offsets = [0, 2, 0], sizes = [1, 1, 1024], strides = [1, 1, 1]} : vector<1x4x1024xf32> to vector<1x1x1024xf32>
    %47 = vector.broadcast %46 : vector<1x1x1024xf32> to vector<1x4x1024xf32>
    %48 = vector.broadcast %8 : vector<1x4x1xf32> to vector<1x4x1024xf32>
    %49 = arith.mulf %47, %48 : vector<1x4x1024xf32>
    %50 = arith.addf %45, %49 : vector<1x4x1024xf32>
    %51 = vector.extract_strided_slice %36 {offsets = [0, 3, 0], sizes = [1, 1, 1024], strides = [1, 1, 1]} : vector<1x4x1024xf32> to vector<1x1x1024xf32>
    %52 = vector.broadcast %51 : vector<1x1x1024xf32> to vector<1x4x1024xf32>
    %53 = vector.broadcast %11 : vector<1x4x1xf32> to vector<1x4x1024xf32>
    %54 = arith.mulf %52, %53 : vector<1x4x1024xf32>
    %55 = arith.addf %50, %54 : vector<1x4x1024xf32>
    %56 = vector.broadcast %12 : vector<1x4x1xf32> to vector<1x4x1024xf32>
    %57 = arith.addf %55, %56 : vector<1x4x1024xf32>
    %c0_19 = arith.constant 0 : index
    %c0_20 = arith.constant 0 : index
    %c1024_21 = arith.constant 1024 : index
    %58 = vector.load %arg5[%c0_19, %c0_20, %c1024_21] : memref<1x4x2048xf32, #tpu.memory_space<vmem>>, vector<1x4x1024xf32>
    tpu.vector_store %arg5[%c0_19, %c0_20, %c1024_21], %57 {strides = array<i32>} : memref<1x4x2048xf32, #tpu.memory_space<vmem>>, vector<1x4x1024xf32>,
    return
  }
  func.func @transform_0(%arg0: i32, %arg1: i32) -> (i32, i32, i32) {
    %c0_i32 = arith.constant 0 : i32
    %c0_i32_0 = arith.constant 0 : i32
    %c0_i32_1 = arith.constant 0 : i32
    %c0_i32_2 = arith.constant 0 : i32
    return %c0_i32, %c0_i32_0, %c0_i32_1 : i32, i32, i32
  }
  func.func @transform_1(%arg0: i32, %arg1: i32) -> (i32, i32, i32) {
    %c0_i32 = arith.constant 0 : i32
    %c0_i32_0 = arith.constant 0 : i32
    %c0_i32_1 = arith.constant 0 : i32
    %c0_i32_2 = arith.constant 0 : i32
    return %c0_i32, %c0_i32_0, %c0_i32_1 : i32, i32, i32
  }
  func.func @transform_2(%arg0: i32, %arg1: i32) -> (i32, i32, i32) {
    %c0_i32 = arith.constant 0 : i32
    %c0_i32_0 = arith.constant 0 : i32
    return %arg0, %c0_i32, %arg1 : i32, i32, i32
  }
  func.func @transform_3(%arg0: i32, %arg1: i32) -> (i32, i32, i32) {
    %c0_i32 = arith.constant 0 : i32
    %c0_i32_0 = arith.constant 0 : i32
    return %arg0, %c0_i32, %arg1 : i32, i32, i32
  }
}

</mosaic_0001>

<bundles_post_ra>
// kernel: pointwise_op_3d.1
= control target key start
LH: loop header
LB: loop body
LE: loop exit
PB: predicated region body
PF: predicated region fallthrough
CT: control target
= control target key end

     0   :  { %s1213_s12 = smov 0   ;;  %s1215_s13 = smov 0   ;;  %s1755_s0 = inlined_call_operand.vmem [shape: f32[4,4,1], index: 0, kind: input, shape index: {}]   ;;  %s1756_s1 = inlined_call_operand.vmem [shape: f32[1,4,1], index: 1, kind: input, shape index: {}]   ;;  %s1757_s2 = inlined_call_operand.vmem [shape: f32[2,4,4096], index: 2, kind: input, shape index: {}]   ;;  %s1758_s3 = inlined_call_operand.vmem [shape: f32[2,4,4096], index: 3, kind: output, shape index: {}]  }
   0x1   :  { %s1217_s14 = smov 0   ;;  %s1219_s15 = smov 0  }
   0x2   :  { %s1221_s16 = smov 0  }
   0x3 LB: > { %s22_s17 = sadd.s32 1, %s1182_s14  ;;  %s25_s18 = sadd.s32 1, %s1186_s15  ;;  %s1190_s16 = sphi %s1221_s16, %s13_s16   ;;  %s1186_s15 = sphi %s1219_s15, %s1812_s15   ;;  %s1182_s14 = sphi %s1217_s14, %s1811_s14   ;;  %s1178_s13 = sphi %s1215_s13, %s1810_s13   ;;  %s1174_s12 = sphi %s1213_s12, %s1809_s12  }
   0x4   : > { %p23_p0 = scmp.ge.s32.totalorder %s22_s17, 2  ;;  %p1097_p1 = scmp.ge.s32.totalorder %s1190_s16, 1 }
   0x5   : > { %p158_p2 = scmp.lt.s32.totalorder %s1190_s16, 5 }
   0x6   : > { %s1814_s17 = smov (%p23_p0, %s22_s17), 0  ;;  %s1816_s18 = smov (!%p23_p0, %s25_s18), %s1186_s15 }
   0x7   : > { %p159_p3 = pnand %p1097_p1, %p158_p2  ;;  %p27_p4 = scmp.ge.s32.totalorder %s1816_s18, 2 }
   0x9   : > { %s1818_s18 = smov (%p27_p4, %s1816_s18), 0  ;;  %162 = sbr.rel (%p159_p3) target bundleno = 179 (0xb3), region = 32 }
   0xe   : > { %v1105_v0 = vld [vmem:[%s1755_s0 + $0x8] sm:$0xf]  ;;  %v210_v1 = vld [vmem:[%s1755_s0] sm:$0xf]  ;;  %v1192_v2 = vmov 0   ;;  %s1098_s29 = sshll.u32 %s1174_s12, 4  ;;  %v226_v6 = vlaneseq }
   0xf   : > { %1151 = vset.pattern.permute.xlu1 %v1192_v2  ;;  %1150 = vset.pattern.permute.xlu0 %v1192_v2  ;;  %v1106_v3 = vld [vmem:[%s1755_s0 + $0xc] sm:$0xf]  ;;  %v1104_v4 = vld [vmem:[%s1755_s0 + $0x4] sm:$0xf]  ;;  %v217_v5 = vld [vmem:[%s1756_s1] sm:$0xf] }
  0x10   : > { %478 = vperm.xlu1 %1151, %v1105_v0   ;;  %300 = vperm.xlu0 %1150, %v210_v1   ;;  %p191_p5 = scmp.lt.s32.totalorder %s1178_s13, 1  ;;  %p193_p6 = scmp.lt.s32.totalorder %s1098_s29, 31  ;;  %v227_v7 = vshrl.u32 %v226_v6, 7 }
  0x12   : > { %s1820_s13 = smov (!%p191_p5, %s1178_s13), 1  ;;  %s1822_s29 = smov (!%p193_p6, %s1098_s29), 31  ;;  %v499_v8 = vsub.s32 3, %v227_v7  ;;  %v503_v9 = vsub.s32 7, %v227_v7  ;;  %v1273_v10 = vsub.s32 0, %v227_v7  ;;  %v1275_v11 = vsub.s32 1, %v227_v7 }
  0x13   : > { %s1099_s30 = sshll.u32 %s1820_s13, 5  ;;  %v1277_v12 = vsub.s32 2, %v227_v7  ;;  %v1283_v15 = vsub.s32 4, %v227_v7  ;;  %v1285_v16 = vsub.s32 5, %v227_v7  ;;  %v1287_v17 = vsub.s32 6, %v227_v7 }
  0x14   : > { %571 = vperm.xlu1 %1151, %v1106_v3   ;;  %385 = vperm.xlu0 %1150, %v1104_v4   ;;  %s1265_s4 = sadd.s32 %s1099_s30, %s1822_s29 }
  0x15   : > { %s1100_s5 = sshll.u32 %s1265_s4, 2 }
  0x16   : > { %s198_s8 = scalar_lea.vmem %s1757_s2, %s1100_s5  ;;  %s1662_s11 = scalar_lea.vmem %s1758_s3, %s1100_s5 }
  0x17   : > { %v1279_v13 = vld [vmem:[%s198_s8] sm:$0xff]  ;;  %v1281_v14 = vld [vmem:[%s198_s8 + $0x8] sm:$0xff]  ;;  %v1289_v18 = vld [vmem:[%s198_s8 + $0x10] sm:$0xff] }
  0x18   : > { %592 = vperm.xlu0 %1150, %v217_v5   ;;  %v1291_v19 = vld [vmem:[%s198_s8 + $0x18] sm:$0xff]  ;;  %v500_v20 = vrot.slane %v1279_v13, %v499_v8  ;;  %v504_v21 = vrot.slane %v1279_v13, %v503_v9  ;;  %v508_v22 = vrot.slane %v1281_v14, %v499_v8  ;;  %v512_v23 = vrot.slane %v1281_v14, %v503_v9  ;;  %v1301_v28 = vld [vmem:[%s198_s8 + $0x20] sm:$0xff]  ;;  %v1303_v29 = vld [vmem:[%s198_s8 + $0x28] sm:$0xff] }
  0x19   : > { %v516_v24 = vrot.slane %v1289_v18, %v499_v8  ;;  %v520_v25 = vrot.slane %v1289_v18, %v503_v9  ;;  %v524_v26 = vrot.slane %v1291_v19, %v499_v8  ;;  %v528_v27 = vrot.slane %v1291_v19, %v503_v9  ;;  %v1305_v30 = vld [vmem:[%s198_s8 + $0x30] sm:$0xff]  ;;  %v1307_v31 = vld [vmem:[%s198_s8 + $0x38] sm:$0xff] }
  0x1a   : > { %v890_v32 = vrot.slane %v1301_v28, %v499_v8  ;;  %v894_v33 = vrot.slane %v1301_v28, %v503_v9  ;;  %v898_v34 = vrot.slane %v1303_v29, %v499_v8  ;;  %v902_v35 = vrot.slane %v1303_v29, %v503_v9 }
  0x1b   : > { %v906_v36 = vrot.slane %v1305_v30, %v499_v8  ;;  %v910_v37 = vrot.slane %v1305_v30, %v503_v9  ;;  %v914_v38 = vrot.slane %v1307_v31, %v499_v8  ;;  %v918_v39 = vrot.slane %v1307_v31, %v503_v9 }
  0x1c   : > { %v1317_v40 = vrot.slane %v500_v20, %v499_v8  ;;  %v1319_v41 = vrot.slane %v504_v21, %v499_v8  ;;  %v1321_v42 = vrot.slane %v508_v22, %v499_v8  ;;  %v1323_v43 = vrot.slane %v512_v23, %v499_v8 }
  0x1d   : > { %v1325_v44 = vrot.slane %v516_v24, %v499_v8  ;;  %v1327_v45 = vrot.slane %v520_v25, %v499_v8  ;;  %v1329_v46 = vrot.slane %v524_v26, %v499_v8  ;;  %v1331_v47 = vrot.slane %v528_v27, %v499_v8 }
  0x1e   : > { %v1333_v48 = vrot.slane %v890_v32, %v499_v8  ;;  %v1335_v49 = vrot.slane %v894_v33, %v499_v8  ;;  %v1337_v50 = vrot.slane %v898_v34, %v499_v8  ;;  %v1339_v51 = vrot.slane %v902_v35, %v499_v8 }
  0x1f   : > { %v1341_v52 = vrot.slane %v906_v36, %v499_v8  ;;  %v1343_v53 = vrot.slane %v910_v37, %v499_v8  ;;  %v1345_v54 = vrot.slane %v914_v38, %v499_v8  ;;  %v1347_v55 = vrot.slane %v918_v39, %v499_v8 }
  0x20   : > { %v229_v56 = vrot.slane %v1279_v13, %v1273_v10  ;;  %v233_v57 = vrot.slane %v1279_v13, %v1283_v15  ;;  %v237_v58 = vrot.slane %v1281_v14, %v1273_v10  ;;  %v241_v59 = vrot.slane %v1281_v14, %v1283_v15 }
  0x21   : > { %v245_v60 = vrot.slane %v1289_v18, %v1273_v10  ;;  %v249_v61 = vrot.slane %v1289_v18, %v1283_v15  ;;  %v253_v62 = vrot.slane %v1291_v19, %v1273_v10  ;;  %v257_v63 = vrot.slane %v1291_v19, %v1283_v15 }
  0x22   : > { %v314_v0 = vrot.slane %v1279_v13, %v1275_v11  ;;  %v318_v1 = vrot.slane %v1279_v13, %v1285_v16  ;;  %v322_v2 = vrot.slane %v1281_v14, %v1275_v11  ;;  %v326_v3 = vrot.slane %v1281_v14, %v1285_v16 }
  0x23   : > { %v330_v4 = vrot.slane %v1289_v18, %v1275_v11  ;;  %v334_v5 = vrot.slane %v1289_v18, %v1285_v16  ;;  %v338_v6 = vrot.slane %v1291_v19, %v1275_v11  ;;  %v342_v7 = vrot.slane %v1291_v19, %v1285_v16 }
  0x24   : > { %v1382_v8 = vrot.slane %v229_v56, %v1273_v10  ;;  %v1385_v9 = vrot.slane %v233_v57, %v1273_v10  ;;  %v1388_v20 = vrot.slane %v237_v58, %v1273_v10  ;;  %v1391_v21 = vrot.slane %v241_v59, %v1273_v10 }
  0x25   : > { %v1394_v22 = vrot.slane %v245_v60, %v1273_v10  ;;  %v1397_v23 = vrot.slane %v249_v61, %v1273_v10  ;;  %v1400_v24 = vrot.slane %v253_v62, %v1273_v10  ;;  %v1403_v25 = vrot.slane %v257_v63, %v1273_v10 }
  0x26   : > { %v1406_v26 = vrot.slane %v314_v0, %v1275_v11  ;;  %v1409_v27 = vrot.slane %v318_v1, %v1275_v11  ;;  %v1412_v32 = vrot.slane %v322_v2, %v1275_v11  ;;  %v1415_v33 = vrot.slane %v326_v3, %v1275_v11 }
  0x27   : > { %v1418_v34 = vrot.slane %v330_v4, %v1275_v11  ;;  %v1421_v35 = vrot.slane %v334_v5, %v1275_v11  ;;  %v1424_v36 = vrot.slane %v338_v6, %v1275_v11  ;;  %v1427_v37 = vrot.slane %v342_v7, %v1275_v11 }
  0x28   : > { %v407_v38 = vrot.slane %v1279_v13, %v1277_v12  ;;  %v411_v39 = vrot.slane %v1279_v13, %v1287_v17  ;;  %v415_v56 = vrot.slane %v1281_v14, %v1277_v12  ;;  %v419_v57 = vrot.slane %v1281_v14, %v1287_v17 }
  0x29   : > { %1759 = vst [vmem:[#allocation2_spill] sm:$0xff] %v1421_v35  ;;  %1760 = vst [vmem:[#allocation3_spill] sm:$0xff] %v1424_v36  ;;  %v423_v58 = vrot.slane %v1289_v18, %v1277_v12  ;;  %v427_v59 = vrot.slane %v1289_v18, %v1287_v17  ;;  %v431_v60 = vrot.slane %v1291_v19, %v1277_v12 }
  0x2a   : > { %1761 = vst [vmem:[#allocation4_spill] sm:$0xff] %v1427_v37  ;;  %v435_v61 = vrot.slane %v1291_v19, %v1287_v17  ;;  %v634_v13 = vrot.slane %v1301_v28, %v1273_v10  ;;  %v638_v62 = vrot.slane %v1301_v28, %v1283_v15  ;;  %v642_v14 = vrot.slane %v1303_v29, %v1273_v10 }
  0x2b   : > { %v646_v63 = vrot.slane %v1303_v29, %v1283_v15  ;;  %v650_v18 = vrot.slane %v1305_v30, %v1273_v10  ;;  %v654_v0 = vrot.slane %v1305_v30, %v1283_v15  ;;  %v658_v19 = vrot.slane %v1307_v31, %v1273_v10 }
  0x2c   : > { %v662_v1 = vrot.slane %v1307_v31, %v1283_v15  ;;  %v447_v2 = vrot.slane %v407_v38, %v1277_v12  ;;  %v451_v3 = vrot.slane %v411_v39, %v1277_v12  ;;  %v455_v4 = vrot.slane %v415_v56, %v1277_v12 }
  0x2d   : > { %v459_v5 = vrot.slane %v419_v57, %v1277_v12  ;;  %v463_v6 = vrot.slane %v423_v58, %v1277_v12  ;;  %v467_v7 = vrot.slane %v427_v59, %v1277_v12  ;;  %v471_v37 = vrot.slane %v431_v60, %v1277_v12 }
  0x2e   : > { %v475_v36 = vrot.slane %v435_v61, %v1277_v12  ;;  %v1470_v35 = vrot.slane %v634_v13, %v1273_v10  ;;  %v1473_v15 = vrot.slane %v638_v62, %v1273_v10  ;;  %v1476_v38 = vrot.slane %v642_v14, %v1273_v10 }
  0x2f   : > { %v1479_v39 = vrot.slane %v646_v63, %v1273_v10  ;;  %v1482_v56 = vrot.slane %v650_v18, %v1273_v10  ;;  %v1485_v57 = vrot.slane %v654_v0, %v1273_v10  ;;  %v1488_v58 = vrot.slane %v658_v19, %v1273_v10 }
  0x30   : > { %1762 = vst [vmem:[#allocation5_spill] sm:$0xff] %v1473_v15  ;;  %1763 = vst [vmem:[#allocation6_spill] sm:$0xff] %v1476_v38  ;;  %v1491_v59 = vrot.slane %v662_v1, %v1273_v10  ;;  %v714_v60 = vrot.slane %v1301_v28, %v1275_v11  ;;  %v718_v61 = vrot.slane %v1301_v28, %v1285_v16 }
  0x31   : > { %1764 = vst [vmem:[#allocation7_spill] sm:$0xff] %v1479_v39  ;;  %1765 = vst [vmem:[#allocation8_spill] sm:$0xff] %v1482_v56  ;;  %v722_v13 = vrot.slane %v1303_v29, %v1275_v11  ;;  %v726_v62 = vrot.slane %v1303_v29, %v1285_v16  ;;  %v730_v14 = vrot.slane %v1305_v30, %v1275_v11 }
  0x32   : > { %1766 = vst [vmem:[#allocation9_spill] sm:$0xff] %v1485_v57  ;;  %1767 = vst [vmem:[#allocation10_spill] sm:$0xff] %v1488_v58  ;;  %v734_v63 = vrot.slane %v1305_v30, %v1285_v16  ;;  %v738_v10 = vrot.slane %v1307_v31, %v1275_v11  ;;  %v742_v18 = vrot.slane %v1307_v31, %v1285_v16 }
  0x33   : > { %1768 = vst [vmem:[#allocation11_spill] sm:$0xff] %v1491_v59  ;;  %v802_v0 = vrot.slane %v1301_v28, %v1277_v12  ;;  %v806_v19 = vrot.slane %v1301_v28, %v1287_v17  ;;  %v810_v1 = vrot.slane %v1303_v29, %v1277_v12  ;;  %v814_v59 = vrot.slane %v1303_v29, %v1287_v17 }
  0x34   : > { %v818_v58 = vrot.slane %v1305_v30, %v1277_v12  ;;  %v822_v57 = vrot.slane %v1305_v30, %v1287_v17  ;;  %v826_v16 = vrot.slane %v1307_v31, %v1277_v12  ;;  %v830_v56 = vrot.slane %v1307_v31, %v1287_v17 }
  0x35   : > { %v1526_v28 = vrot.slane %v714_v60, %v1275_v11  ;;  %v1529_v39 = vrot.slane %v718_v61, %v1275_v11  ;;  %v1532_v29 = vrot.slane %v722_v13, %v1275_v11  ;;  %v1535_v38 = vrot.slane %v726_v62, %v1275_v11 }
  0x36   : > { %v1538_v30 = vrot.slane %v730_v14, %v1275_v11  ;;  %v1541_v15 = vrot.slane %v734_v63, %v1275_v11  ;;  %v1544_v17 = vrot.slane %v738_v10, %v1275_v11  ;;  %v1547_v31 = vrot.slane %v742_v18, %v1275_v11 }
  0x37   : > { %v1550_v60 = vrot.slane %v802_v0, %v1277_v12  ;;  %v1553_v61 = vrot.slane %v806_v19, %v1277_v12  ;;  %v1556_v13 = vrot.slane %v810_v1, %v1277_v12  ;;  %v1559_v62 = vrot.slane %v814_v59, %v1277_v12 }
  0x38   : > { %v1566_v10 = vrot.slane %v818_v58, %v1277_v12  ;;  %v1569_v11 = vrot.slane %v822_v57, %v1277_v12  ;;  %v1572_v18 = vrot.slane %v826_v16, %v1277_v12  ;;  %v1575_v0 = vrot.slane %v830_v56, %v1277_v12 }
  0x39   : > { %1769 = vst [vmem:[#allocation12_spill] sm:$0xff] %v1553_v61  ;;  %1770 = vst [vmem:[#allocation13_spill] sm:$0xff] %v1556_v13 }
  0x3a   : > { %1771 = vst [vmem:[#allocation14_spill] sm:$0xff] %v1559_v62  ;;  %1772 = vst [vmem:[#allocation15_spill] sm:$0xff] %v1566_v10 }
  0x3b   : > { %1773 = vst [vmem:[#allocation16_spill] sm:$0xff] %v1569_v11  ;;  %1774 = vst [vmem:[#allocation17_spill] sm:$0xff] %v1572_v18 }
  0x3c   : > { %1775 = vst [vmem:[#allocation18_spill] sm:$0xff] %v1575_v0 }
  0x8b   : > { %v1561_v14 = vpop.permute.xlu1 %478  ;;  %v1563_v63 = vpop.permute.xlu0 %300 }
  0x8c   : > { %v303_v59 = vmul.f32 %v1563_v63, %v1382_v8  ;;  %v304_v19 = vmul.f32 %v1563_v63, %v1385_v9  ;;  %v305_v1 = vmul.f32 %v1563_v63, %v1388_v20  ;;  %v306_v58 = vmul.f32 %v1563_v63, %v1391_v21 }
  0x8d   : > { %v307_v57 = vmul.f32 %v1563_v63, %v1394_v22  ;;  %v308_v16 = vmul.f32 %v1563_v63, %v1397_v23  ;;  %v309_v12 = vmul.f32 %v1563_v63, %v1400_v24  ;;  %v310_v8 = vmul.f32 %v1563_v63, %v1403_v25 }
  0x8e   : > { %v481_v9 = vmul.f32 %v1561_v14, %v447_v2  ;;  %v482_v56 = vmul.f32 %v1561_v14, %v451_v3  ;;  %v483_v20 = vmul.f32 %v1561_v14, %v455_v4  ;;  %v484_v21 = vmul.f32 %v1561_v14, %v459_v5 }
  0x8f   : > { %v572_v0 = vpop.permute.xlu1 %571  ;;  %v485_v22 = vmul.f32 %v1561_v14, %v463_v6  ;;  %v486_v18 = vmul.f32 %v1561_v14, %v467_v7  ;;  %v487_v23 = vmul.f32 %v1561_v14, %v471_v37  ;;  %v488_v24 = vmul.f32 %v1561_v14, %v475_v36  ;;  %v1609_v10 = vpop.permute.xlu0 %385  ;;  %v1786_v37 = vld [vmem:[#allocation4_spill] sm:$0xff] }
  0x90   : > { %v574_v11 = vmul.f32 %v572_v0, %v1317_v40  ;;  %v575_v25 = vmul.f32 %v572_v0, %v1319_v41  ;;  %v576_v2 = vmul.f32 %v572_v0, %v1321_v42  ;;  %v577_v3 = vmul.f32 %v572_v0, %v1323_v43 }
  0x91   : > { %v578_v4 = vmul.f32 %v572_v0, %v1325_v44  ;;  %v579_v5 = vmul.f32 %v572_v0, %v1327_v45  ;;  %v580_v6 = vmul.f32 %v572_v0, %v1329_v46  ;;  %v581_v7 = vmul.f32 %v572_v0, %v1331_v47 }
  0x92   : > { %v1612_v36 = vmul.f32 %v1333_v48, %v572_v0  ;;  %v1615_v40 = vmul.f32 %v1335_v49, %v572_v0  ;;  %v1618_v41 = vmul.f32 %v1337_v50, %v572_v0  ;;  %v1621_v42 = vmul.f32 %v1339_v51, %v572_v0 }
  0x93   : > { %v1624_v43 = vmul.f32 %v1341_v52, %v572_v0  ;;  %v1627_v44 = vmul.f32 %v1343_v53, %v572_v0  ;;  %v1630_v45 = vmul.f32 %v1345_v54, %v572_v0  ;;  %v1633_v46 = vmul.f32 %v1347_v55, %v572_v0  ;;  %v1784_v52 = vld [vmem:[#allocation2_spill] sm:$0xff]  ;;  %v1785_v54 = vld [vmem:[#allocation3_spill] sm:$0xff] }
  0x94   : > { %1776 = vst [vmem:[#allocation19_spill] sm:$0xff] %v1612_v36  ;;  %1777 = vst [vmem:[#allocation20_spill] sm:$0xff] %v1615_v40  ;;  %v388_v47 = vmul.f32 %v1609_v10, %v1406_v26  ;;  %v389_v48 = vmul.f32 %v1609_v10, %v1409_v27  ;;  %v390_v49 = vmul.f32 %v1609_v10, %v1412_v32 }
  0x95   : > { %1778 = vst [vmem:[#allocation21_spill] sm:$0xff] %v1618_v41  ;;  %1779 = vst [vmem:[#allocation22_spill] sm:$0xff] %v1621_v42  ;;  %v391_v50 = vmul.f32 %v1609_v10, %v1415_v33  ;;  %v392_v51 = vmul.f32 %v1609_v10, %v1418_v34  ;;  %v393_v53 = vmul.f32 %v1609_v10, %v1784_v52 }
  0x96   : > { %1780 = vst [vmem:[#allocation23_spill] sm:$0xff] %v1624_v43  ;;  %1781 = vst [vmem:[#allocation24_spill] sm:$0xff] %v1627_v44  ;;  %v394_v55 = vmul.f32 %v1609_v10, %v1785_v54  ;;  %v395_v26 = vmul.f32 %v1609_v10, %v1786_v37  ;;  %v396_v0 = vadd.f32 %v388_v47, %v303_v59 }
  0x97   : > { %1782 = vst [vmem:[#allocation25_spill] sm:$0xff] %v1630_v45  ;;  %1783 = vst [vmem:[#allocation26_spill] sm:$0xff] %v1633_v46  ;;  %v397_v27 = vadd.f32 %v389_v48, %v304_v19  ;;  %v398_v46 = vadd.f32 %v390_v49, %v305_v1  ;;  %v399_v45 = vadd.f32 %v391_v50, %v306_v58  ;;  %v1651_v19 = vpop.permute.xlu0 %592 }
  0x98   : > { %v400_v32 = vadd.f32 %v392_v51, %v307_v57  ;;  %v401_v44 = vadd.f32 %v393_v53, %v308_v16  ;;  %v402_v43 = vadd.f32 %v394_v55, %v309_v12  ;;  %v403_v33 = vadd.f32 %v395_v26, %v310_v8 }
  0x99   : > { %v489_v42 = vadd.f32 %v481_v9, %v396_v0  ;;  %v490_v41 = vadd.f32 %v482_v56, %v397_v27  ;;  %v491_v34 = vadd.f32 %v483_v20, %v398_v46  ;;  %v492_v40 = vadd.f32 %v484_v21, %v399_v45  ;;  %v1794_v0 = vld [vmem:[#allocation12_spill] sm:$0xff]  ;;  %v1795_v27 = vld [vmem:[#allocation13_spill] sm:$0xff] }
  0x9a   : > { %v493_v36 = vadd.f32 %v485_v22, %v400_v32  ;;  %v494_v52 = vadd.f32 %v486_v18, %v401_v44  ;;  %v495_v62 = vadd.f32 %v487_v23, %v402_v43  ;;  %v496_v54 = vadd.f32 %v488_v24, %v403_v33  ;;  %v1787_v22 = vld [vmem:[#allocation5_spill] sm:$0xff]  ;;  %v1796_v32 = vld [vmem:[#allocation14_spill] sm:$0xff] }
  0x9b   : > { %v582_v13 = vadd.f32 %v574_v11, %v489_v42  ;;  %v583_v61 = vadd.f32 %v575_v25, %v490_v41  ;;  %v584_v37 = vadd.f32 %v576_v2, %v491_v34  ;;  %v585_v59 = vadd.f32 %v577_v3, %v492_v40  ;;  %v1788_v2 = vld [vmem:[#allocation6_spill] sm:$0xff]  ;;  %v1793_v42 = vld [vmem:[#allocation11_spill] sm:$0xff]  ;;  %v1798_v34 = vld [vmem:[#allocation16_spill] sm:$0xff] }
  0x9c   : > { %v586_v1 = vadd.f32 %v578_v4, %v493_v36  ;;  %v587_v58 = vadd.f32 %v579_v5, %v494_v52  ;;  %v588_v57 = vadd.f32 %v580_v6, %v495_v62  ;;  %v589_v16 = vadd.f32 %v581_v7, %v496_v54  ;;  %v1789_v4 = vld [vmem:[#allocation7_spill] sm:$0xff]  ;;  %v1790_v6 = vld [vmem:[#allocation8_spill] sm:$0xff]  ;;  %v1791_v36 = vld [vmem:[#allocation9_spill] sm:$0xff] }
  0x9d   : > { %v595_v12 = vadd.f32 %v1651_v19, %v582_v13  ;;  %v596_v8 = vadd.f32 %v1651_v19, %v583_v61  ;;  %v597_v9 = vadd.f32 %v1651_v19, %v584_v37  ;;  %v598_v18 = vadd.f32 %v1651_v19, %v585_v59  ;;  %v1799_v54 = vld [vmem:[#allocation17_spill] sm:$0xff] }
  0x9e   : > { %v599_v11 = vadd.f32 %v1651_v19, %v586_v1  ;;  %v600_v62 = vadd.f32 %v1651_v19, %v587_v58  ;;  %v601_v13 = vadd.f32 %v1651_v19, %v588_v57  ;;  %v602_v61 = vadd.f32 %v1651_v19, %v589_v16 }
  0x9f   : > { %v611_v56 = vcombine.low %v595_v12, %v596_v8  ;;  %v612_v20 = vcombine.low %v597_v9, %v598_v18  ;;  %v703_v21 = vmul.f32 %v1470_v35, %v1563_v63  ;;  %v704_v23 = vmul.f32 %v1787_v22, %v1563_v63  ;;  %v1792_v35 = vld [vmem:[#allocation10_spill] sm:$0xff] }
  0xa0   : > { %v613_v24 = vcombine.low %v599_v11, %v600_v62  ;;  %v614_v25 = vcombine.low %v601_v13, %v602_v61  ;;  %v705_v3 = vmul.f32 %v1788_v2, %v1563_v63  ;;  %v706_v5 = vmul.f32 %v1789_v4, %v1563_v63  ;;  %v1801_v11 = vld [vmem:[#allocation19_spill] sm:$0xff]  ;;  %v1802_v13 = vld [vmem:[#allocation20_spill] sm:$0xff]  ;;  %v1807_v2 = vld [vmem:[#allocation25_spill] sm:$0xff] }
  0xa1   : > { %619 = vst [vmem:[%s1662_s11] sm:$0xff] %v611_v56  ;;  %620 = vst [vmem:[%s1662_s11 + $0x8] sm:$0xff] %v612_v20  ;;  %v707_v7 = vmul.f32 %v1790_v6, %v1563_v63  ;;  %v708_v40 = vmul.f32 %v1791_v36, %v1563_v63  ;;  %v709_v41 = vmul.f32 %v1792_v35, %v1563_v63  ;;  %v1803_v56 = vld [vmem:[#allocation21_spill] sm:$0xff]  ;;  %v1808_v4 = vld [vmem:[#allocation26_spill] sm:$0xff] }
  0xa2   : > { %v710_v43 = vmul.f32 %v1793_v42, %v1563_v63  ;;  %621 = vst [vmem:[%s1662_s11 + $0x10] sm:$0xff] %v613_v24  ;;  %622 = vst [vmem:[%s1662_s11 + $0x18] sm:$0xff] %v614_v25  ;;  %v783_v44 = vmul.f32 %v1526_v28, %v1609_v10  ;;  %v784_v45 = vmul.f32 %v1529_v39, %v1609_v10  ;;  %v1806_v25 = vld [vmem:[#allocation24_spill] sm:$0xff] }
  0xa3   : > { %v785_v46 = vmul.f32 %v1532_v29, %v1609_v10  ;;  %v786_v47 = vmul.f32 %v1535_v38, %v1609_v10  ;;  %v787_v48 = vmul.f32 %v1538_v30, %v1609_v10  ;;  %v788_v63 = vmul.f32 %v1541_v15, %v1609_v10 }
  0xa4   : > { %v789_v49 = vmul.f32 %v1544_v17, %v1609_v10  ;;  %v790_v28 = vmul.f32 %v1547_v31, %v1609_v10  ;;  %v791_v50 = vadd.f32 %v783_v44, %v703_v21  ;;  %v792_v39 = vadd.f32 %v784_v45, %v704_v23  ;;  %v1797_v10 = vld [vmem:[#allocation15_spill] sm:$0xff]  ;;  %v1804_v21 = vld [vmem:[#allocation22_spill] sm:$0xff] }
  0xa5   : > { %v793_v51 = vadd.f32 %v785_v46, %v705_v3  ;;  %v794_v53 = vadd.f32 %v786_v47, %v706_v5  ;;  %v795_v29 = vadd.f32 %v787_v48, %v707_v7  ;;  %v796_v55 = vadd.f32 %v788_v63, %v708_v40  ;;  %v1805_v23 = vld [vmem:[#allocation23_spill] sm:$0xff] }
  0xa6   : > { %v797_v26 = vadd.f32 %v789_v49, %v709_v41  ;;  %v798_v38 = vadd.f32 %v790_v28, %v710_v43  ;;  %v871_v30 = vmul.f32 %v1550_v60, %v1561_v14  ;;  %v872_v15 = vmul.f32 %v1794_v0, %v1561_v14  ;;  %v1800_v60 = vld [vmem:[#allocation18_spill] sm:$0xff] }
  0xa7   : > { %v873_v17 = vmul.f32 %v1795_v27, %v1561_v14  ;;  %v874_v31 = vmul.f32 %v1796_v32, %v1561_v14  ;;  %v875_v33 = vmul.f32 %v1797_v10, %v1561_v14  ;;  %v876_v52 = vmul.f32 %v1798_v34, %v1561_v14 }
  0xa8   : > { %v877_v37 = vmul.f32 %v1799_v54, %v1561_v14  ;;  %v878_v59 = vmul.f32 %v1800_v60, %v1561_v14  ;;  %v879_v1 = vadd.f32 %v871_v30, %v791_v50  ;;  %v880_v58 = vadd.f32 %v872_v15, %v792_v39 }
  0xa9   : > { %v881_v57 = vadd.f32 %v873_v17, %v793_v51  ;;  %v882_v16 = vadd.f32 %v874_v31, %v794_v53  ;;  %v883_v12 = vadd.f32 %v875_v33, %v795_v29  ;;  %v884_v8 = vadd.f32 %v876_v52, %v796_v55 }
  0xaa   : > { %v885_v9 = vadd.f32 %v877_v37, %v797_v26  ;;  %v886_v18 = vadd.f32 %v878_v59, %v798_v38  ;;  %v967_v62 = vadd.f32 %v1801_v11, %v879_v1  ;;  %v968_v61 = vadd.f32 %v1802_v13, %v880_v58 }
  0xab   : > { %v969_v20 = vadd.f32 %v1803_v56, %v881_v57  ;;  %v970_v22 = vadd.f32 %v1804_v21, %v882_v16  ;;  %v971_v24 = vadd.f32 %v1805_v23, %v883_v12  ;;  %v972_v14 = vadd.f32 %v1806_v25, %v884_v8 }
  0xac   : > { %v973_v3 = vadd.f32 %v1807_v2, %v885_v9  ;;  %v974_v5 = vadd.f32 %v1808_v4, %v886_v18  ;;  %v975_v6 = vadd.f32 %v967_v62, %v1651_v19  ;;  %v976_v7 = vadd.f32 %v968_v61, %v1651_v19 }
  0xad   : > { %v977_v36 = vadd.f32 %v969_v20, %v1651_v19  ;;  %v978_v40 = vadd.f32 %v970_v22, %v1651_v19  ;;  %v979_v35 = vadd.f32 %v971_v24, %v1651_v19  ;;  %v980_v41 = vadd.f32 %v972_v14, %v1651_v19 }
  0xae   : > { %v981_v42 = vadd.f32 %v973_v3, %v1651_v19  ;;  %v982_v43 = vadd.f32 %v974_v5, %v1651_v19  ;;  %v991_v44 = vcombine.low %v975_v6, %v976_v7 }
  0xaf   : > { %v992_v45 = vcombine.low %v977_v36, %v978_v40  ;;  %v993_v46 = vcombine.low %v979_v35, %v980_v41 }
  0xb0   : > { %v994_v47 = vcombine.low %v981_v42, %v982_v43  ;;  %999 = vst [vmem:[%s1662_s11 + $0x20] sm:$0xff] %v991_v44 }
  0xb1   : > { %1000 = vst [vmem:[%s1662_s11 + $0x28] sm:$0xff] %v992_v45  ;;  %1001 = vst [vmem:[%s1662_s11 + $0x30] sm:$0xff] %v993_v46 }
  0xb2   : > { %1002 = vst [vmem:[%s1662_s11 + $0x38] sm:$0xff] %v994_v47 }
  0xb3 PF: > { %s13_s16 = sadd.s32 1, %s1190_s16   ;;  %s1809_s12 = smov %s1182_s14 }
  0xb4   : > { %p10_p7 = scmp.ge.s32.totalorder %s13_s16, 6   ;;  %s1810_s13 = smov %s1186_s15 }
  0xb5   : > { %s1811_s14 = smov %s1814_s17  ;;  %s1812_s15 = smov %s1818_s18 }
  0xb6   :  { %12 = sbr.rel (!%p10_p7) target bundleno = 3 (0x3), region = 65 }

// kernel: reverse.1
= control target key start
LH: loop header
LB: loop body
LE: loop exit
PB: predicated region body
PF: predicated region fallthrough
CT: control target
= control target key end

     0   :  { %s296_s0 = inlined_call_operand.vmem [shape: f32[2,4,8,8,3], index: 0, kind: input, shape index: {}]   ;;  %s297_s1 = inlined_call_operand.vmem [shape: f32[2,4,8,8,3], index: 1, kind: output, shape index: {}]  }
   0x1   :  { %v96_v0 = vld [vmem:[%s296_s0 + $0x10] sm:$0xff]  ;;  %v99_v2 = vld [vmem:[%s296_s0 + $0x28] sm:$0xff]  ;;  %v103_v4 = vld [vmem:[%s296_s0 + $0x40] sm:$0xff] }
   0x2   :  { %v97_v1 = vld [vmem:[%s296_s0 + $0x70] sm:$0xff]  ;;  %4 = vst [vmem:[%s297_s1] sm:$0xff] %v96_v0  ;;  %100 = vst [vmem:[%s297_s1 + $0x18] sm:$0xff] %v99_v2  ;;  %v101_v3 = vld [vmem:[%s296_s0 + $0x88] sm:$0xff] }
   0x3   :  { %98 = vst [vmem:[%s297_s1 + $0x60] sm:$0xff] %v97_v1  ;;  %v105_v5 = vld [vmem:[%s296_s0 + $0xa0] sm:$0xff]  ;;  %102 = vst [vmem:[%s297_s1 + $0x78] sm:$0xff] %v101_v3  ;;  %v107_v6 = vld [vmem:[%s296_s0 + $0x58] sm:$0xff] }
   0x4   :  { %104 = vst [vmem:[%s297_s1 + $0x30] sm:$0xff] %v103_v4  ;;  %106 = vst [vmem:[%s297_s1 + $0x90] sm:$0xff] %v105_v5  ;;  %v109_v7 = vld [vmem:[%s296_s0 + $0xb8] sm:$0xff]  ;;  %v111_v8 = vld [vmem:[%s296_s0 + $0x8] sm:$0xff] }
   0x5   :  { %108 = vst [vmem:[%s297_s1 + $0x48] sm:$0xff] %v107_v6  ;;  %110 = vst [vmem:[%s297_s1 + $0xa8] sm:$0xff] %v109_v7  ;;  %v113_v9 = vld [vmem:[%s296_s0 + $0x68] sm:$0xff]  ;;  %v115_v10 = vld [vmem:[%s296_s0 + $0x20] sm:$0xff] }
   0x6   :  { %112 = vst [vmem:[%s297_s1 + $0x8] sm:$0xff] %v111_v8  ;;  %v117_v11 = vld [vmem:[%s296_s0 + $0x80] sm:$0xff]  ;;  %114 = vst [vmem:[%s297_s1 + $0x68] sm:$0xff] %v113_v9  ;;  %v119_v12 = vld [vmem:[%s296_s0 + $0x38] sm:$0xff] }
   0x7   :  { %116 = vst [vmem:[%s297_s1 + $0x20] sm:$0xff] %v115_v10  ;;  %118 = vst [vmem:[%s297_s1 + $0x80] sm:$0xff] %v117_v11  ;;  %v121_v13 = vld [vmem:[%s296_s0 + $0x98] sm:$0xff]  ;;  %v123_v14 = vld [vmem:[%s296_s0 + $0x50] sm:$0xff] }
   0x8   :  { %120 = vst [vmem:[%s297_s1 + $0x38] sm:$0xff] %v119_v12  ;;  %122 = vst [vmem:[%s297_s1 + $0x98] sm:$0xff] %v121_v13  ;;  %v125_v15 = vld [vmem:[%s296_s0 + $0xb0] sm:$0xff]  ;;  %v65_v16 = vld [vmem:[%s296_s0] sm:$0xff] }
   0x9   :  { %124 = vst [vmem:[%s297_s1 + $0x50] sm:$0xff] %v123_v14  ;;  %v128_v17 = vld [vmem:[%s296_s0 + $0x60] sm:$0xff]  ;;  %126 = vst [vmem:[%s297_s1 + $0xb0] sm:$0xff] %v125_v15  ;;  %v130_v18 = vld [vmem:[%s296_s0 + $0x18] sm:$0xff] }
   0xa   :  { %127 = vst [vmem:[%s297_s1 + $0x10] sm:$0xff] %v65_v16  ;;  %129 = vst [vmem:[%s297_s1 + $0x70] sm:$0xff] %v128_v17  ;;  %v132_v19 = vld [vmem:[%s296_s0 + $0x78] sm:$0xff]  ;;  %v134_v20 = vld [vmem:[%s296_s0 + $0x30] sm:$0xff] }
   0xb   :  { %131 = vst [vmem:[%s297_s1 + $0x28] sm:$0xff] %v130_v18  ;;  %133 = vst [vmem:[%s297_s1 + $0x88] sm:$0xff] %v132_v19  ;;  %v136_v21 = vld [vmem:[%s296_s0 + $0x90] sm:$0xff]  ;;  %v138_v22 = vld [vmem:[%s296_s0 + $0x48] sm:$0xff] }
   0xc   :  { %135 = vst [vmem:[%s297_s1 + $0x40] sm:$0xff] %v134_v20  ;;  %v140_v23 = vld [vmem:[%s296_s0 + $0xa8] sm:$0xff]  ;;  %137 = vst [vmem:[%s297_s1 + $0xa0] sm:$0xff] %v136_v21 }
   0xd   :  { %139 = vst [vmem:[%s297_s1 + $0x58] sm:$0xff] %v138_v22  ;;  %141 = vst [vmem:[%s297_s1 + $0xb8] sm:$0xff] %v140_v23 }

</bundles_post_ra>
